<compile_context>
chip_gen: v7x
topology: tpu7x:2x2x1
jax: 0.10.0
libtpu: 0.0.40
codegen_flags: <defaults>
</compile_context>

<pallas_src>
import jax
import jax.numpy as jnp
from jax.experimental import pallas as pl
from jax.experimental.pallas import tpu as pltpu


def fnn_kernel(x_ref, w1_ref, b1_ref, w2_ref, b2_ref, o_ref):
    # Cast x f32 -> bf16 on the VPU (rides under the DMA); MXU accumulates f32.
    x_bf = x_ref[...].astype(jnp.bfloat16)
    # hidden = relu(x @ W1 + b1)
    h = jnp.dot(x_bf, w1_ref[...], preferred_element_type=jnp.float32)
    h = jnp.maximum(h + b1_ref[...], 0.0)          # b1 is [1, H] -> broadcast
    # logits = hidden @ W2 + b2.  W2 is zero-padded to 128 lanes so the MXU
    # tile is full width; only the *stored* slice is the true class count, so
    # the dominant HBM stream (output writeback) is 32x smaller.
    out_full = jnp.dot(h.astype(jnp.bfloat16), w2_ref[...],
                       preferred_element_type=jnp.float32)
    c = o_ref.shape[-1]
    o_ref[...] = (out_full[:, :c] + b2_ref[...]).astype(o_ref.dtype)


def _round_up(v, m):
    return ((v + m - 1) // m) * m


def paper_fnn(x, w1, b1, w2, b2, *, tb=4096):
    """relu(x @ w1 + b1) @ w2 + b2 as one fused Pallas TPU kernel.

    x : [B, D] f32 (batch-major, feature dim on lanes)
    w1: [D, H], b1: [H] or [1, H]    (nn.Linear hidden, pre-transposed)
    w2: [H, C], b2: [C] or [1, C]    (nn.Linear output, pre-transposed)

    `tb` is the batch tile.  4096 is safe on every generation (double-buffered
    working set ~6 MiB at D=32); sweep 2048-8192 per chip and raise
    pltpu.CompilerParams(vmem_limit_bytes=...) if you push it much higher
    (v5e's scoped default is 16 MiB, v6e/v7x 32 MiB).
    """
    B, D = x.shape
    H = w1.shape[1]
    C = w2.shape[1]

    # PyTorch nn.Linear biases are 1-D; reshape defensively to [1, N].
    b1 = jnp.asarray(b1, jnp.float32).reshape(1, H)
    b2 = jnp.asarray(b2, jnp.float32).reshape(1, C)

    # Lane-dense MXU operand for the second matmul: pad W2 columns to 128.
    # (Operand only — the stored output stays C-wide.)
    C_pad = _round_up(max(C, 128), 128)
    if C_pad != C:
        w2 = jnp.pad(w2, ((0, 0), (0, C_pad - C)))

    # Batch tile: multiple of 8 sublanes, at most ~half the batch so large-B
    # runs always have >=2 grid steps (v7x megacore), capped by `tb` (VMEM).
    TB = max(8, min(tb, _round_up(pl.cdiv(B, 2), 8)))
    B_pad = _round_up(B, TB)
    if B_pad != B:
        x = jnp.pad(x, ((0, B_pad - B), (0, 0)))

    # Weights are tiny -> cast once here (ideally cached by the caller).
    w1_bf = w1.astype(jnp.bfloat16)
    w2_bf = w2.astype(jnp.bfloat16)

    grid = (B_pad // TB,)
    flops = 2 * B_pad * (D * H + H * C_pad)
    bytes_accessed = (x.size * 4 + w1_bf.size * 2 + w2_bf.size * 2
                      + b1.size * 4 + b2.size * 4 + B_pad * C * 4)

    out = pl.pallas_call(
        fnn_kernel,
        out_shape=jax.ShapeDtypeStruct((B_pad, C), jnp.float32),
        grid_spec=pl.GridSpec(
            grid=grid,
            in_specs=[
                pl.BlockSpec((TB, D), lambda i: (i, 0)),      # x: batch tile
                pl.BlockSpec((D, H), lambda i: (0, 0)),       # W1: resident
                pl.BlockSpec((1, H), lambda i: (0, 0)),       # b1: resident
                pl.BlockSpec((H, C_pad), lambda i: (0, 0)),   # W2: resident
                pl.BlockSpec((1, C), lambda i: (0, 0)),       # b2: resident
            ],
            out_specs=pl.BlockSpec((TB, C), lambda i: (i, 0)),
        ),
        compiler_params=pltpu.CompilerParams(
            dimension_semantics=("parallel",)),
        cost_estimate=pl.CostEstimate(
            flops=flops, transcendentals=0, bytes_accessed=bytes_accessed),
    )(x, w1_bf, b1, w2_bf, b2)

    # Only strip batch padding (class dim is already exact); skip the slice
    # entirely when no padding was added.
    return out if B_pad == B else out[:B]


if __name__ == "__main__":
    # Small shapes consistent with the module: batch=8, input_dim=32,
    # hidden=128 (fixed by the module), num_classes=4.
    B, D, H, C = 8, 32, 128, 4

    key = jax.random.PRNGKey(0)
    kx, kw1, kb1, kw2, kb2 = jax.random.split(key, 5)

    x = jax.random.normal(kx, (B, D), dtype=jnp.float32)
    # Deterministic parameter init (uniform, roughly matching nn.Linear scale).
    # Biases are 1-D, exactly like PyTorch's nn.Linear.
    w1 = jax.random.uniform(kw1, (D, H), jnp.float32, -1.0, 1.0) / jnp.sqrt(D)
    b1 = jax.random.uniform(kb1, (H,), jnp.float32, -1.0, 1.0) / jnp.sqrt(D)
    w2 = jax.random.uniform(kw2, (H, C), jnp.float32, -1.0, 1.0) / jnp.sqrt(H)
    b2 = jax.random.uniform(kb2, (C,), jnp.float32, -1.0, 1.0) / jnp.sqrt(H)

    out = paper_fnn(x, w1, b1, w2, b2)
    jax.block_until_ready(out)
    assert out.shape == (B, C)

    # Reference 1: same math with matching bf16 MXU operands / f32 accumulate.
    xb, w1b, w2b = (x.astype(jnp.bfloat16), w1.astype(jnp.bfloat16),
                    w2.astype(jnp.bfloat16))
    h_ref = jnp.maximum(
        jnp.dot(xb, w1b, preferred_element_type=jnp.float32) + b1[None, :], 0.0)
    ref_bf16 = jnp.dot(h_ref.astype(jnp.bfloat16), w2b,
                       preferred_element_type=jnp.float32) + b2[None, :]
    assert jnp.allclose(out, ref_bf16, atol=1e-3, rtol=1e-3)

    # Reference 2: pure f32 forward (PyTorch semantics); loose tolerance for
    # the deliberate bf16 MXU-operand cast.
    ref_f32 = jnp.maximum(x @ w1 + b1[None, :], 0.0) @ w2 + b2[None, :]
    assert jnp.allclose(out, ref_f32, atol=3e-2, rtol=3e-2)

    print("KERNEL_OK")
</pallas_src>

<mosaic_0001>
module attributes {stable_mosaic.version = 11 : i64} {
  func.func @fnn_kernel(%arg0: i32, %arg1: memref<8x32xf32, #tpu.memory_space<vmem>>, %arg2: memref<32x128xbf16, #tpu.memory_space<vmem>>, %arg3: memref<1x128xf32, #tpu.memory_space<vmem>>, %arg4: memref<128x128xbf16, #tpu.memory_space<vmem>>, %arg5: memref<1x4xf32, #tpu.memory_space<vmem>>, %arg6: memref<8x4xf32, #tpu.memory_space<vmem>>) attributes {dimension_semantics = [#tpu.dimension_semantics<parallel>], iteration_bounds = array<i64: 1>, scalar_prefetch = 0 : i64, scratch_operands = 0 : i64, tpu.core_type = #tpu.core_type<tc>, window_params = [{transform_indices = @transform_0, window_bounds = array<i64: 8, 32>}, {pipeline_mode = #tpu.pipeline_mode<synchronous>, transform_indices = @transform_1, window_bounds = array<i64: 32, 128>}, {pipeline_mode = #tpu.pipeline_mode<synchronous>, transform_indices = @transform_2, window_bounds = array<i64: 1, 128>}, {pipeline_mode = #tpu.pipeline_mode<synchronous>, transform_indices = @transform_3, window_bounds = array<i64: 128, 128>}, {pipeline_mode = #tpu.pipeline_mode<synchronous>, transform_indices = @transform_4, window_bounds = array<i64: 1, 4>}, {transform_indices = @transform_5, window_bounds = array<i64: 8, 4>}]} {
    %c0 = arith.constant 0 : index
    %c0_0 = arith.constant 0 : index
    %0 = vector.load %arg1[%c0, %c0_0] : memref<8x32xf32, #tpu.memory_space<vmem>>, vector<8x32xf32>
    %1 = arith.truncf %0 : vector<8x32xf32> to vector<8x32xbf16>
    %c0_1 = arith.constant 0 : index
    %c0_2 = arith.constant 0 : index
    %2 = vector.load %arg2[%c0_1, %c0_2] : memref<32x128xbf16, #tpu.memory_space<vmem>>, vector<32x128xbf16>
    %cst = arith.constant dense<0.000000e+00> : vector<8x128xf32>
    %3 = tpu.matmul %1, %2, %cst {dimension_numbers = #tpu.dot_dimension_numbers<[1], [0], [0], [1], [0, 0, 1, 1], [], []>} : vector<8x32xbf16>, vector<32x128xbf16>, vector<8x128xf32> -> vector<8x128xf32>
    %c0_3 = arith.constant 0 : index
    %c0_4 = arith.constant 0 : index
    %4 = vector.load %arg3[%c0_3, %c0_4] : memref<1x128xf32, #tpu.memory_space<vmem>>, vector<1x128xf32>
    %5 = vector.broadcast %4 : vector<1x128xf32> to vector<8x128xf32>
    %6 = arith.addf %3, %5 : vector<8x128xf32>
    %cst_5 = arith.constant 0.000000e+00 : f32
    %7 = vector.broadcast %cst_5 : f32 to vector<8x128xf32>
    %8 = arith.maximumf %6, %7 : vector<8x128xf32>
    %9 = arith.truncf %8 : vector<8x128xf32> to vector<8x128xbf16>
    %c0_6 = arith.constant 0 : index
    %c0_7 = arith.constant 0 : index
    %10 = vector.load %arg4[%c0_6, %c0_7] : memref<128x128xbf16, #tpu.memory_space<vmem>>, vector<128x128xbf16>
    %cst_8 = arith.constant dense<0.000000e+00> : vector<8x128xf32>
    %11 = tpu.matmul %9, %10, %cst_8 {dimension_numbers = #tpu.dot_dimension_numbers<[1], [0], [0], [1], [0, 0, 1, 1], [], []>} : vector<8x128xbf16>, vector<128x128xbf16>, vector<8x128xf32> -> vector<8x128xf32>
    %12 = vector.extract_strided_slice %11 {offsets = [0, 0], sizes = [8, 4], strides = [1, 1]} : vector<8x128xf32> to vector<8x4xf32>
    %c0_9 = arith.constant 0 : index
    %c0_10 = arith.constant 0 : index
    %13 = vector.load %arg5[%c0_9, %c0_10] : memref<1x4xf32, #tpu.memory_space<vmem>>, vector<1x4xf32>
    %14 = vector.broadcast %13 : vector<1x4xf32> to vector<8x4xf32>
    %15 = arith.addf %12, %14 : vector<8x4xf32>
    %c0_11 = arith.constant 0 : index
    %c0_12 = arith.constant 0 : index
    %16 = vector.load %arg6[%c0_11, %c0_12] : memref<8x4xf32, #tpu.memory_space<vmem>>, vector<8x4xf32>
    tpu.vector_store %arg6[%c0_11, %c0_12], %15 {strides = array<i32>} : memref<8x4xf32, #tpu.memory_space<vmem>>, vector<8x4xf32>,
    return
  }
  func.func @transform_0(%arg0: i32) -> (i32, i32) {
    %c0_i32 = arith.constant 0 : i32
    %c0_i32_0 = arith.constant 0 : i32
    return %arg0, %c0_i32 : i32, i32
  }
  func.func @transform_1(%arg0: i32) -> (i32, i32) {
    %c0_i32 = arith.constant 0 : i32
    %c0_i32_0 = arith.constant 0 : i32
    %c0_i32_1 = arith.constant 0 : i32
    return %c0_i32, %c0_i32_0 : i32, i32
  }
  func.func @transform_2(%arg0: i32) -> (i32, i32) {
    %c0_i32 = arith.constant 0 : i32
    %c0_i32_0 = arith.constant 0 : i32
    %c0_i32_1 = arith.constant 0 : i32
    return %c0_i32, %c0_i32_0 : i32, i32
  }
  func.func @transform_3(%arg0: i32) -> (i32, i32) {
    %c0_i32 = arith.constant 0 : i32
    %c0_i32_0 = arith.constant 0 : i32
    %c0_i32_1 = arith.constant 0 : i32
    return %c0_i32, %c0_i32_0 : i32, i32
  }
  func.func @transform_4(%arg0: i32) -> (i32, i32) {
    %c0_i32 = arith.constant 0 : i32
    %c0_i32_0 = arith.constant 0 : i32
    %c0_i32_1 = arith.constant 0 : i32
    return %c0_i32, %c0_i32_0 : i32, i32
  }
  func.func @transform_5(%arg0: i32) -> (i32, i32) {
    %c0_i32 = arith.constant 0 : i32
    %c0_i32_0 = arith.constant 0 : i32
    return %arg0, %c0_i32 : i32, i32
  }
}

</mosaic_0001>

<bundles_post_ra>
// kernel: tpu_custom_call.1
= control target key start
LH: loop header
LB: loop body
LE: loop exit
PB: predicated region body
PF: predicated region fallthrough
CT: control target
= control target key end

     0   :  { %10 = vsyncpa [#allocation3], 0  ;;  %s479_s0 = inlined_call_operand.hbm [shape: f32[8,32], index: 0, kind: input, shape index: {}]   ;;  %s480_s1 = inlined_call_operand.hbm [shape: bf16[32,128], index: 1, kind: input, shape index: {}]   ;;  %s481_s2 = inlined_call_operand.vmem [shape: f32[1,128], index: 2, kind: input, shape index: {}]   ;;  %s482_s3 = inlined_call_operand.hbm [shape: bf16[128,128], index: 3, kind: input, shape index: {}]   ;;  %s483_s4 = inlined_call_operand.vmem [shape: f32[1,4], index: 4, kind: input, shape index: {}]   ;;  %s484_s5 = inlined_call_operand.vmem [shape: f32[8,4], index: 5, kind: output, shape index: {}]  }
   0x1   :  { %11 = vsyncpa [#allocation5], 0  ;;  %s391_s18 = smov [#allocation4]   ;;  %s321_s22 = scalar_lea.hbm %s480_s1, 256 }
   0x2   :  { %s27_s19 = sshll.u32 %s391_s18, 4  ;;  %p322_p0 = scmp.ne.s32.totalorder %s480_s1, %s321_s22  ;;  %s28_s19 = int_to_ptr.vmem [resolvable:$true] %s27_s19 }
   0x3   :  { %p325_p1 = scmp.lt.u32.totalorder %s321_s22, %s480_s1 }
   0x5   :  { %p327_p2 = pnand %p325_p1, %p322_p0 }
   0x7   :  { %330 = shalt.err (!%p327_p2)
}
   0x8   :  { %s331_s27 = scalar_lea.vmem %s28_s19, 256  ;;  %p336_p4 = scmp.lt.s32.totalorder %s28_s19, %s28_s19 }
   0x9   :  { %p332_p3 = scmp.ne.s32.totalorder %s28_s19, %s331_s27  ;;  %p337_p5 = scmp.lt.s32.totalorder %s331_s27, %s331_s27 }
   0xb   :  { %p338_p6 = por %p337_p5, %p336_p4 }
   0xd   :  { %p339_p7 = pnand %p338_p6, %p332_p3 }
   0xf   :  { %342 = shalt.err (!%p339_p7)
}
  0x10   :  { %s392_s28 = smov 64   ;;  %s393_s29 = smov 4  }
  0x11   :  { %33 = dma.hbm_to_vmem [thread:$0]  %s480_s1, 256, %s28_s19, [#allocation5], %s392_s28, %s392_s28, %s393_s29  }
  0x12   :  { %s394_s7 = smov [#allocation2]   ;;  %s395_s9 = smov [#allocation6]  }
  0x13   :  { %s18_s8 = sshll.u32 %s394_s7, 4  ;;  %s41_s10 = sshll.u32 %s395_s9, 4  ;;  %s19_s8 = int_to_ptr.vmem [resolvable:$true] %s18_s8  ;;  %s42_s10 = int_to_ptr.vmem [resolvable:$true] %s41_s10 }
  0x14   :  { %s343_s13 = scalar_lea.hbm %s479_s0, 128 }
  0x15   :  { %p344_p8 = scmp.ne.s32.totalorder %s479_s0, %s343_s13  ;;  %p347_p9 = scmp.lt.u32.totalorder %s343_s13, %s479_s0 }
  0x17   :  { %p349_p10 = pnand %p347_p9, %p344_p8 }
  0x19   :  { %352 = shalt.err (!%p349_p10)
}
  0x1a   :  { %s353_s1 = scalar_lea.vmem %s19_s8, 128  ;;  %p358_p12 = scmp.lt.s32.totalorder %s19_s8, %s19_s8 }
  0x1b   :  { %p354_p11 = scmp.ne.s32.totalorder %s19_s8, %s353_s1  ;;  %p359_p13 = scmp.lt.s32.totalorder %s353_s1, %s353_s1 }
  0x1d   :  { %p360_p0 = por %p359_p13, %p358_p12 }
  0x1f   :  { %p361_p1 = pnand %p360_p0, %p354_p11 }
  0x21   :  { %364 = shalt.err (!%p361_p1)
}
  0x22   :  { %21 = dma.hbm_to_vmem [thread:$0]  %s479_s0, 128, %s19_s8, [#allocation3]  }
  0x23   :  { %s365_s22 = scalar_lea.hbm %s482_s3, 1024 }
  0x24   :  { %p366_p2 = scmp.ne.s32.totalorder %s482_s3, %s365_s22  ;;  %p369_p3 = scmp.lt.u32.totalorder %s365_s22, %s482_s3 }
  0x26   :  { %p371_p4 = pnand %p369_p3, %p366_p2 }
  0x28   :  { %374 = shalt.err (!%p371_p4)
}
  0x29   :  { %s375_s27 = scalar_lea.vmem %s42_s10, 1024  ;;  %p380_p6 = scmp.lt.s32.totalorder %s42_s10, %s42_s10 }
  0x2a   :  { %p376_p5 = scmp.ne.s32.totalorder %s42_s10, %s375_s27  ;;  %p381_p7 = scmp.lt.s32.totalorder %s375_s27, %s375_s27 }
  0x2c   :  { %p382_p8 = por %p381_p7, %p380_p6 }
  0x2e   :  { %p383_p9 = pnand %p382_p8, %p376_p5 }
  0x30   :  { %386 = shalt.err (!%p383_p9)
}
  0x31   :  { %47 = dma.hbm_to_vmem [thread:$0]  %s482_s3, 1024, %s42_s10, [#allocation5], %s392_s28, %s392_s28, %s393_s29  }
  0x32   :  { %387 = dma.done.wait [#allocation3], 128  }
  0x33   :  { %388 = vsyncadd [#allocation3], 4294967168 }
  0x34   :  { %389 = dma.done.wait [#allocation5], 1280  }
  0x35   :  { %390 = vsyncadd [#allocation5], 4294966016  ;;  %v396_v0 = vmov 0.0   ;;  %vm397_vm0 = vmmov 0   ;;  %v311_v1 = vld [vmem:[#allocation4] sm:$0xff]   ;;  %v312_v2 = vld [vmem:[#allocation4 + $0x8] sm:$0xff]  }
  0x36   :  { %276 = vmatprep.subr.bf16.mxu0 %v396_v0  ;;  %280 = vmatprep.mubr.msk.bf16.mxu0 %vm397_vm0, %v396_v0  ;;  %v60_v3 = vld [vmem:[#allocation2] sm:$0xff]  ;;  %v313_v4 = vld [vmem:[#allocation6] sm:$0xff]   ;;  %vm85_vm1 = vcmask 261120   ;;  %v315_v7 = vld [vmem:[#allocation6 + $0x10] sm:$0xff]   ;;  %vm243_vm2 = vcmask 31744  }
  0x37   :  { %284 = vmatprep.subr.bf16.mxu1 %v396_v0  ;;  %300 = vmatprep.mubr.msk.bf16.mxu1 %vm397_vm0, %v396_v0  ;;  %v61_v5 = vpack.c.bf16 %v60_v3, %v60_v3  ;;  %v314_v6 = vld [vmem:[#allocation6 + $0x8] sm:$0xff]   ;;  %v316_v8 = vld [vmem:[#allocation6 + $0x18] sm:$0xff]   ;;  %v317_v9 = vld [vmem:[#allocation6 + $0x20] sm:$0xff]  }
  0x38   :  { %277 = vmatpush3.bf16.msra.mxu0 %v311_v1  ;;  %285 = vmatpush3.bf16.msra.mxu1 %v313_v4  ;;  %v318_v10 = vld [vmem:[#allocation6 + $0x28] sm:$0xff]   ;;  %v319_v11 = vld [vmem:[#allocation6 + $0x30] sm:$0xff]   ;;  %v320_v12 = vld [vmem:[#allocation6 + $0x38] sm:$0xff]  }
  0x39   :  { %278 = vmatprep.subr.bf16.mxu0 %v396_v0  ;;  %286 = vmatprep.subr.bf16.mxu1 %v396_v0  ;;  %v251_v13 = vld [vmem:[%s481_s2] ss:$0 sm:$0xff] }
  0x3a   :  { %v263_v21 = vld [vmem:[%s483_s4] ss:$0 sm:$0xff] }
  0x3c   :  { %279 = vmatpush3.bf16.msra.mxu0 %v312_v2  ;;  %287 = vmatpush3.bf16.msra.mxu1 %v314_v6 }
  0x3d   :  { %288 = vmatprep.subr.bf16.mxu1 %v396_v0 }
  0x3f   :  { %281 = vmatmul.mubr.msk.bf16.vlgmr.msra.gmra.mrb[0].mxu0 %vm85_vm1, %v61_v5 }
  0x40   :  { %289 = vmatpush3.bf16.msra.mxu1 %v315_v7 }
  0x41   :  { %290 = vmatprep.subr.bf16.mxu1 %v396_v0 }
  0x44   :  { %291 = vmatpush3.bf16.msra.mxu1 %v316_v8 }
  0x45   :  { %292 = vmatprep.subr.bf16.mxu1 %v396_v0 }
  0x48   :  { %293 = vmatpush3.bf16.msra.mxu1 %v317_v9 }
  0x49   :  { %294 = vmatprep.subr.bf16.mxu1 %v396_v0 }
  0x4c   :  { %295 = vmatpush3.bf16.msra.mxu1 %v318_v10 }
  0x4d   :  { %296 = vmatprep.subr.bf16.mxu1 %v396_v0 }
  0x50   :  { %297 = vmatpush3.bf16.msra.mxu1 %v319_v11 }
  0x51   :  { %298 = vmatprep.subr.bf16.mxu1 %v396_v0 }
  0x54   :  { %299 = vmatpush3.bf16.msra.mxu1 %v320_v12 }
 0x112   :  { %v123_v14 = vpop.f32.mrb[0].mxu0 }
 0x113   :  { %v124_v15 = vadd.f32 %v251_v13, %v123_v14  ;;  %v282_v16 = vpop.f32.mrb[1].mxu0 }
 0x114   :  { %v126_v17 = vpop.f32.mrb[2].mxu0 }
 0x115   :  { %v129_v18 = vmax.f32 %v124_v15, 0.0  ;;  %v283_v19 = vpop.f32.mrb[3].mxu0 }
 0x117   :  { %v130_v20 = vpack.c.bf16 %v129_v18, %v129_v18 }
 0x119   :  { %301 = vmatmul.mubr.bf16.vlgmr.msra.gmra.mrb[0].mxu1 %v130_v20 }
 0x1ec   :  { %v229_v22 = vpop.f32.mrb[0].mxu1 }
 0x1ed   :  { %v242_v23 = vadd.f32 %v263_v21, %v229_v22  ;;  %v302_v24 = vpop.f32.mrb[1].mxu1 }
 0x1ee   :  { %v232_v25 = vpop.f32.mrb[2].mxu1 }
 0x1ef   :  { %244 = vst.msk [vmem:[%s484_s5] sm:$0xff] %vm243_vm2, %v242_v23  ;;  %v303_v26 = vpop.f32.mrb[3].mxu1 }
 0x1f0   :  { %249 = vsyncpa [#allocation3], 1 }
 0x1f1   :  { %250 = vsyncpa [#allocation5], 1 }

</bundles_post_ra>
